<compile_context>
chip_gen: v5e
topology: v5e:2x2
jax: 0.10.0
libtpu: 0.0.40
codegen_flags: <defaults>
</compile_context>

<pallas_src>
from functools import partial

import jax
import jax.numpy as jnp
from jax import lax
from jax.experimental import pallas as pl
from jax.experimental.pallas import tpu as pltpu

# Normalized separable taps: outer([1,2,1]/4, [1,2,1]/4) == [[1,2,1],[2,4,2],[1,2,1]]/16.
# (The module's registered buffer f=[1,2,1] is a fixed constant; normalized=True.)
_F0, _F1 = 0.25, 0.5


def _blur_kernel(x_ref, o_ref, *, H, W):
    # x_ref / o_ref: (T, H*W) -- T independent (batch*channel) planes, spatially flattened.
    HW = H * W
    x = x_ref[...].astype(jnp.float32)

    # One (1, HW) iota feeds every boundary mask; jnp.where broadcasts it over the
    # T sublanes, so we never materialize a block-sized index plane.
    j = lax.broadcasted_iota(jnp.int32, (1, HW), 1)
    top = j < W                       # row 0
    bot = j >= HW - W                 # row H-1
    colj = j % W
    lft = colj == 0                   # col 0 of each row
    rgt = colj == W - 1               # col W-1 of each row

    # --- vertical [1,2,1]/4 pass, reflect rows (row -1 -> row 1, row H -> row H-2).
    # In the flattened layout a vertical shift is a lane roll by W (XLU slot, ~free).
    # The wrapped lanes of each roll are exactly the lanes the *other* roll holds the
    # reflected value for, so two broadcast selects fix both borders with no gathers.
    up = pltpu.roll(x, W, axis=1)           # x[r-1, c]  (junk in row 0: wrapped)
    dn = pltpu.roll(x, HW - W, axis=1)      # x[r+1, c]  (junk in row H-1: wrapped)
    v = _F1 * x + _F0 * (jnp.where(top, dn, up) + jnp.where(bot, up, dn))

    # --- horizontal [1,2,1]/4 pass, reflect cols (col -1 -> col 1, col W -> col W-2).
    gl = pltpu.roll(v, 1, axis=1)           # v[j-1]  (junk at col 0 of each row)
    gr = pltpu.roll(v, HW - 1, axis=1)      # v[j+1]  (junk at col W-1 of each row)
    out = _F1 * v + _F0 * (jnp.where(lft, gr, gl) + jnp.where(rgt, gl, gr))

    o_ref[...] = out.astype(o_ref.dtype)


def _budgets():
    """Generation-aware (vmem_limit_bytes, max_block_elems-f32).

    v5e/v6e have 128 MiB VMEM per TensorCore -> ~4 MiB blocks, 64 MiB scoped limit.
    v7x has only 64 MiB per TensorCore -> cap blocks at ~2 MiB, 48 MiB scoped limit.
    Falls back to the conservative (v7x) budget if the hardware query is unavailable.
    """
    cap = 64 * 1024 * 1024
    try:
        info = pltpu.get_tpu_info()
        cap = int(getattr(info, "vmem_capacity_bytes", cap)) or cap
    except Exception:
        pass
    if cap >= 100 * 1024 * 1024:                  # v5e / v6e (128 MiB physical VMEM)
        return 64 * 1024 * 1024, 1024 * 1024      # 64 MiB scoped, ~4 MiB f32 blocks
    return 48 * 1024 * 1024, 512 * 1024           # v7x (64 MiB): 48 MiB scoped, ~2 MiB


def _pick_row_tile(n, hw, max_block_elems, min_steps=4):
    """Pick a tile of the (b*c) axis.

    Constraints: divides n; respects the (8, 128) sublane rule (multiple of 8, the full
    axis, or 1); block stays under the f32 element budget. Among legal tiles, prefer one
    that leaves >= min_steps (else >= 2) grid steps for DMA/compute overlap and megacore
    sharding -- but only when the resulting per-step block is not trivially small, so we
    do not shred tiny problems into pure pipeline overhead.
    """
    def legal(t):
        return n % t == 0 and (t % 8 == 0 or t == n or t == 1)

    cap = max(1, min(n, max_block_elems // max(hw, 1)))
    cands = [t for t in range(cap, 0, -1) if legal(t)]
    if not cands:
        return 1
    min_block_elems = 64 * 1024          # ~256 KiB f32: below this, more steps just add overhead
    for need in (min_steps, 2):
        for t in cands:                  # descending: biggest tile that still gives `need` steps
            if n // t >= need and t * hw >= min_block_elems:
                return t
    return cands[0]


def blur(x):
    """Forward of Blur: depthwise 3x3 [1,2,1]x[1,2,1]/16 blur, reflect 'same' padding."""
    b, c, h, w = x.shape
    assert h >= 2 and w >= 2, "reflect padding needs spatial dims >= 2"
    n, hw = b * c, h * w

    vmem_limit, max_block_elems = _budgets()
    # Per grid step we hold roughly 2x(in+out) double buffers plus a few block-sized f32
    # temps; make sure a single plane cannot blow the budget when the picker falls back
    # to tile=1 for very large spatial planes.
    # TODO(synk): add a second grid axis over row-bands of H with a 1-row halo for
    # planes larger than this (restores sublane-dense vregs and bounded VMEM).
    assert hw * 4 * 8 <= vmem_limit, (
        f"spatial plane of {hw} elements is too large for single-plane blocks")

    xf = x.reshape(n, hw)                       # free (contiguous) relayout, no HBM pass
    tile = _pick_row_tile(n, hw, max_block_elems)
    grid = (n // tile,)

    kern = partial(_blur_kernel, H=h, W=w)
    out = pl.pallas_call(
        kern,
        out_shape=jax.ShapeDtypeStruct((n, hw), x.dtype),
        grid_spec=pltpu.PrefetchScalarGridSpec(
            num_scalar_prefetch=0,
            grid=grid,
            in_specs=[pl.BlockSpec((tile, hw), lambda i: (i, 0))],
            out_specs=pl.BlockSpec((tile, hw), lambda i: (i, 0)),
        ),
        compiler_params=pltpu.CompilerParams(
            dimension_semantics=("parallel",),
            vmem_limit_bytes=vmem_limit,
        ),
    )(xf)
    return out.reshape(b, c, h, w)


def _ref_blur(x):
    """Pure-JAX reference: kornia filter2d([1,2,1]x[1,2,1], normalized=True, reflect)."""
    f = jnp.array([1.0, 2.0, 1.0], jnp.float32)
    k = f[:, None] * f[None, :]
    k = k / jnp.sum(k)
    b, c, h, w = x.shape
    xp = jnp.pad(x, ((0, 0), (0, 0), (1, 1), (1, 1)), mode="reflect")
    out = jnp.zeros(x.shape, jnp.float32)
    for di in range(3):
        for dj in range(3):
            out = out + k[di, dj] * xp[:, :, di:di + h, dj:dj + w].astype(jnp.float32)
    return out.astype(x.dtype)


if __name__ == "__main__":
    key = jax.random.PRNGKey(0)
    b, c, h, w = 2, 4, 16, 16
    x = jax.random.normal(key, (b, c, h, w), jnp.float32)

    out = blur(x)
    out = jax.block_until_ready(out)

    ref = _ref_blur(x)
    assert out.shape == (b, c, h, w), out.shape
    assert jnp.allclose(out, ref, atol=1e-5, rtol=1e-5), \
        float(jnp.max(jnp.abs(out - ref)))

    print("KERNEL_OK")
</pallas_src>

<mosaic_0001>
module attributes {stable_mosaic.version = 11 : i64} {
  func.func @_blur_kernel(%arg0: i32, %arg1: memref<8x256xf32, #tpu.memory_space<vmem>>, %arg2: memref<8x256xf32, #tpu.memory_space<vmem>>) attributes {dimension_semantics = [#tpu.dimension_semantics<parallel>], iteration_bounds = array<i64: 1>, scalar_prefetch = 0 : i64, scratch_operands = 0 : i64, tpu.core_type = #tpu.core_type<tc>, window_params = [{transform_indices = @transform_0, window_bounds = array<i64: 8, 256>}, {transform_indices = @transform_1, window_bounds = array<i64: 8, 256>}]} {
    %c0 = arith.constant 0 : index
    %c0_0 = arith.constant 0 : index
    %0 = vector.load %arg1[%c0, %c0_0] : memref<8x256xf32, #tpu.memory_space<vmem>>, vector<8x256xf32>
    %1 = tpu.iota {dimensions = array<i32: 1>} : vector<1x256xi32>
    %c16_i32 = arith.constant 16 : i32
    %2 = vector.broadcast %c16_i32 : i32 to vector<1x256xi32>
    %3 = arith.cmpi slt, %1, %2 : vector<1x256xi32>
    %c240_i32 = arith.constant 240 : i32
    %4 = vector.broadcast %c240_i32 : i32 to vector<1x256xi32>
    %5 = arith.cmpi sge, %1, %4 : vector<1x256xi32>
    %c16_i32_1 = arith.constant 16 : i32
    %c0_i32 = arith.constant 0 : i32
    %6 = arith.cmpi eq, %c16_i32_1, %c0_i32 : i32
    %c1_i32 = arith.constant 1 : i32
    %7 = arith.select %6, %c1_i32, %c16_i32_1 : i32
    %8 = vector.broadcast %7 : i32 to vector<1x256xi32>
    %9 = arith.remsi %1, %8 : vector<1x256xi32>
    %c0_i32_2 = arith.constant 0 : i32
    %10 = vector.broadcast %c0_i32_2 : i32 to vector<1x256xi32>
    %11 = arith.cmpi ne, %9, %10 : vector<1x256xi32>
    %c0_i32_3 = arith.constant 0 : i32
    %12 = vector.broadcast %c0_i32_3 : i32 to vector<1x256xi32>
    %13 = arith.cmpi slt, %9, %12 : vector<1x256xi32>
    %c0_i32_4 = arith.constant 0 : i32
    %14 = arith.cmpi slt, %7, %c0_i32_4 : i32
    %15 = vector.broadcast %14 : i1 to vector<1x256xi1>
    %16 = vector.broadcast %15 : vector<1x256xi1> to vector<1x256xi1>
    %17 = arith.xori %13, %16 : vector<1x256xi1>
    %18 = arith.andi %17, %11 : vector<1x256xi1>
    %19 = vector.broadcast %7 : i32 to vector<1x256xi32>
    %20 = arith.addi %9, %19 : vector<1x256xi32>
    %21 = arith.select %18, %20, %9 : vector<1x256xi1>, vector<1x256xi32>
    %c0_i32_5 = arith.constant 0 : i32
    %22 = vector.broadcast %c0_i32_5 : i32 to vector<1x256xi32>
    %23 = arith.cmpi eq, %21, %22 : vector<1x256xi32>
    %c15_i32 = arith.constant 15 : i32
    %24 = vector.broadcast %c15_i32 : i32 to vector<1x256xi32>
    %25 = arith.cmpi eq, %21, %24 : vector<1x256xi32>
    %c16_i32_6 = arith.constant 16 : i32
    %26 = tpu.dynamic_rotate %0 by %c16_i32_6 dim 1 : vector<8x256xf32>, i32 -> vector<8x256xf32>
    %c240_i32_7 = arith.constant 240 : i32
    %27 = tpu.dynamic_rotate %0 by %c240_i32_7 dim 1 : vector<8x256xf32>, i32 -> vector<8x256xf32>
    %cst = arith.constant 5.000000e-01 : f32
    %28 = vector.broadcast %cst : f32 to vector<8x256xf32>
    %29 = arith.mulf %28, %0 : vector<8x256xf32>
    %30 = vector.shape_cast %3 : vector<1x256xi1> to vector<1x256xi1>
    %31 = vector.broadcast %30 : vector<1x256xi1> to vector<8x256xi1>
    %32 = arith.select %31, %27, %26 : vector<8x256xi1>, vector<8x256xf32>
    %33 = vector.shape_cast %5 : vector<1x256xi1> to vector<1x256xi1>
    %34 = vector.broadcast %33 : vector<1x256xi1> to vector<8x256xi1>
    %35 = arith.select %34, %26, %27 : vector<8x256xi1>, vector<8x256xf32>
    %36 = arith.addf %32, %35 : vector<8x256xf32>
    %cst_8 = arith.constant 2.500000e-01 : f32
    %37 = vector.broadcast %cst_8 : f32 to vector<8x256xf32>
    %38 = arith.mulf %37, %36 : vector<8x256xf32>
    %39 = arith.addf %29, %38 : vector<8x256xf32>
    %c1_i32_9 = arith.constant 1 : i32
    %40 = tpu.dynamic_rotate %39 by %c1_i32_9 dim 1 : vector<8x256xf32>, i32 -> vector<8x256xf32>
    %c255_i32 = arith.constant 255 : i32
    %41 = tpu.dynamic_rotate %39 by %c255_i32 dim 1 : vector<8x256xf32>, i32 -> vector<8x256xf32>
    %cst_10 = arith.constant 5.000000e-01 : f32
    %42 = vector.broadcast %cst_10 : f32 to vector<8x256xf32>
    %43 = arith.mulf %42, %39 : vector<8x256xf32>
    %44 = vector.shape_cast %23 : vector<1x256xi1> to vector<1x256xi1>
    %45 = vector.broadcast %44 : vector<1x256xi1> to vector<8x256xi1>
    %46 = arith.select %45, %41, %40 : vector<8x256xi1>, vector<8x256xf32>
    %47 = vector.shape_cast %25 : vector<1x256xi1> to vector<1x256xi1>
    %48 = vector.broadcast %47 : vector<1x256xi1> to vector<8x256xi1>
    %49 = arith.select %48, %40, %41 : vector<8x256xi1>, vector<8x256xf32>
    %50 = arith.addf %46, %49 : vector<8x256xf32>
    %cst_11 = arith.constant 2.500000e-01 : f32
    %51 = vector.broadcast %cst_11 : f32 to vector<8x256xf32>
    %52 = arith.mulf %51, %50 : vector<8x256xf32>
    %53 = arith.addf %43, %52 : vector<8x256xf32>
    %c0_12 = arith.constant 0 : index
    %c0_13 = arith.constant 0 : index
    %54 = vector.load %arg2[%c0_12, %c0_13] : memref<8x256xf32, #tpu.memory_space<vmem>>, vector<8x256xf32>
    tpu.vector_store %arg2[%c0_12, %c0_13], %53 {strides = array<i32>} : memref<8x256xf32, #tpu.memory_space<vmem>>, vector<8x256xf32>,
    return
  }
  func.func @transform_0(%arg0: i32) -> (i32, i32) {
    %c0_i32 = arith.constant 0 : i32
    %c0_i32_0 = arith.constant 0 : i32
    return %arg0, %c0_i32 : i32, i32
  }
  func.func @transform_1(%arg0: i32) -> (i32, i32) {
    %c0_i32 = arith.constant 0 : i32
    %c0_i32_0 = arith.constant 0 : i32
    return %arg0, %c0_i32 : i32, i32
  }
}

</mosaic_0001>

<bundles_post_ra>
// kernel: tpu_custom_call.1
= control target key start
LH: loop header
LB: loop body
LE: loop exit
PB: predicated region body
PF: predicated region fallthrough
CT: control target
= control target key end

     0   :  { %6 = vsyncpa [#allocation3], 0  ;;  %s226_s0 = inlined_call_operand.hbm [shape: f32[8,256], index: 0, kind: input, shape index: {}]   ;;  %s227_s1 = inlined_call_operand.hbm [shape: f32[8,256], index: 1, kind: output, shape index: {}]  }
   0x1   :  { %7 = vsyncpa [#allocation4], 0  ;;  %s13_s8 = sshll.u32 %s226_s0, 4  ;;  %s204_s9 = smov [#allocation2]   ;;  %s14_s8 = int_to_ptr.hbm [resolvable:$true] %s13_s8 }
   0x2   :  { %s15_s10 = sshll.u32 %s204_s9, 4  ;;  %s16_s10 = int_to_ptr.vmem [resolvable:$true] %s15_s10 }
   0x3   :  { %18 = dma.hbm_to_vmem [thread:$0]  %s14_s8, 256, %s16_s10, [#allocation3]  }
   0x4   :  { %200 = dma.done.wait [#allocation3], 256  }
   0x5   :  { %201 = vsyncadd [#allocation3], 4294967040  ;;  %v23_v0 = vld [vmem:[#allocation2] sm:$0xff]  ;;  %s205_s11 = smov 112   ;;  %s206_s12 = smov 16   ;;  %v24_v1 = vld [vmem:[#allocation2 + $0x8] sm:$0xff]  ;;  %v25_v2 = vlaneseq }
   0x6   :  { %66 = vrot.lane.b32.xlu1 %v23_v0, %s205_s11  ;;  %60 = vrot.lane.b32.xlu0 %v23_v0, %s206_s12  ;;  %v73_v15 = vmul.f32 0.5, %v23_v0  ;;  %v74_v16 = vmul.f32 0.5, %v24_v1  ;;  %s207_s0 = smov 127   ;;  %s208_s13 = smov 1  }
   0x7   :  { %v26_v3 = vand.u32 127, %v25_v2  ;;  %s209_s14 = smov [#allocation5]   ;;  %s136_s18 = sshll.u32 %s227_s1, 4  ;;  %s137_s18 = int_to_ptr.hbm [resolvable:$true] %s136_s18 }
   0x8   :  { %s134_s15 = sshll.u32 %s209_s14, 4  ;;  %s135_s15 = int_to_ptr.vmem [resolvable:$true] %s134_s15 }
   0x9   :  { %v27_v6 = vadd.s32 128, %v26_v3  ;;  %vm70_vm0 = vcmp.lt.s32.totalorder %v26_v3, 112  ;;  %vm28_vm1 = vcmp.lt.s32.totalorder %v26_v3, 16  ;;  %v36_v24 = vand.u32 15, %v26_v3 }
   0xa   :  { %vm97_vm3 = vcmp.lt.s32.totalorder %v26_v3, 1  ;;  %vm104_vm4 = vcmp.lt.s32.totalorder %v26_v3, 127 }
   0xb   :  { %vm31_vm2 = vcmp.ge.s32.totalorder %v27_v6, 240  ;;  %v43_v25 = vand.u32 15, %v27_v6  ;;  %vm56_vm5 = vcmp.eq.s32.totalorder %v36_v24, 0  ;;  %vm58_vm7 = vcmp.eq.s32.totalorder %v36_v24, 15 }
   0xd   :  { %vm57_vm6 = vcmp.eq.s32.totalorder %v43_v25, 0  ;;  %vm59_vm8 = vcmp.eq.s32.totalorder %v43_v25, 15 }
   0xe   :  { %68 = vrot.lane.b32.xlu1 %v24_v1, %s205_s11  ;;  %62 = vrot.lane.b32.xlu0 %v24_v1, %s206_s12 }
  0x78   :  { %v67_v4 = vpop.permute.xlu1 %66  ;;  %v61_v5 = vpop.permute.xlu0 %60 }
  0x80   :  { %v69_v7 = vpop.permute.xlu1 %68  ;;  %v63_v8 = vpop.permute.xlu0 %62 }
  0x81   :  { %v71_v9 = vsel %vm70_vm0, %v67_v4, %v69_v7  ;;  %v72_v10 = vsel %vm70_vm0, %v69_v7, %v67_v4  ;;  %v64_v11 = vsel %vm28_vm1, %v61_v5, %v63_v8  ;;  %v65_v12 = vsel %vm28_vm1, %v63_v8, %v61_v5 }
  0x82   :  { %v79_v13 = vsel %vm28_vm1, %v71_v9, %v65_v12  ;;  %v86_v14 = vsel %vm31_vm2, %v64_v11, %v72_v10 }
  0x83   :  { %v87_v17 = vadd.f32 %v79_v13, %v71_v9  ;;  %v88_v18 = vadd.f32 %v86_v14, %v64_v11 }
  0x85   :  { %v89_v19 = vmul.f32 0.25, %v87_v17  ;;  %v90_v20 = vmul.f32 0.25, %v88_v18 }
  0x87   :  { %v92_v21 = vadd.f32 %v90_v20, %v74_v16  ;;  %v91_v22 = vadd.f32 %v89_v19, %v73_v15 }
  0x89   :  { %102 = vrot.lane.b32.xlu1 %v92_v21, %s207_s0  ;;  %100 = vrot.lane.b32.xlu0 %v91_v22, %s207_s0  ;;  %v108_v39 = vmul.f32 0.5, %v92_v21  ;;  %v107_v40 = vmul.f32 0.5, %v91_v22 }
  0x8a   :  { %93 = vrot.lane.b32.xlu2 %v91_v22, %s208_s13 }
  0x92   :  { %95 = vrot.lane.b32.xlu2 %v92_v21, %s208_s13 }
  0xe4   :  { %v94_v23 = vpop.permute.xlu2 %93 }
  0xec   :  { %v96_v26 = vpop.permute.xlu2 %95 }
  0xed   :  { %v98_v29 = vsel %vm97_vm3, %v94_v23, %v96_v26  ;;  %v99_v30 = vsel %vm97_vm3, %v96_v26, %v94_v23 }
  0xfb   :  { %v103_v27 = vpop.permute.xlu1 %102  ;;  %v101_v28 = vpop.permute.xlu0 %100 }
  0xfc   :  { %v105_v31 = vsel %vm104_vm4, %v101_v28, %v103_v27  ;;  %v106_v32 = vsel %vm104_vm4, %v103_v27, %v101_v28 }
  0xfd   :  { %v113_v33 = vsel %vm56_vm5, %v105_v31, %v99_v30  ;;  %v114_v34 = vsel %vm57_vm6, %v106_v32, %v98_v29  ;;  %v119_v35 = vsel %vm58_vm7, %v99_v30, %v105_v31  ;;  %v120_v36 = vsel %vm59_vm8, %v98_v29, %v106_v32 }
  0xfe   :  { %v121_v37 = vadd.f32 %v119_v35, %v113_v33  ;;  %v122_v38 = vadd.f32 %v120_v36, %v114_v34 }
 0x100   :  { %v123_v41 = vmul.f32 0.25, %v121_v37  ;;  %v124_v42 = vmul.f32 0.25, %v122_v38 }
 0x102   :  { %v125_v43 = vadd.f32 %v123_v41, %v107_v40  ;;  %v126_v44 = vadd.f32 %v124_v42, %v108_v39 }
 0x104   :  { %127 = vst [vmem:[#allocation5] sm:$0xff] %v125_v43 }
 0x105   :  { %128 = vst [vmem:[#allocation5 + $0x8] sm:$0xff] %v126_v44 }
 0x106   :  { %139 = dma.vmem_to_hbm [thread:$0]  %s135_s15, 256, %s137_s18, [#allocation4]  }
 0x107   :  { %202 = dma.done.wait [#allocation4], 256  }
 0x108   :  { %203 = vsyncadd [#allocation4], 4294967040 }
 0x109   :  { %144 = vsyncpa [#allocation3], 1 }
 0x10a   :  { %145 = vsyncpa [#allocation4], 1 }

</bundles_post_ra>
